<compile_context>
chip_gen: v5e
topology: v5e:2x2
jax: 0.10.0
libtpu: 0.0.40
codegen_flags: <defaults>
</compile_context>

<pallas_src>
import functools
import math

import jax
import jax.numpy as jnp
import numpy as np
from jax.experimental import pallas as pl
from jax.experimental.pallas import tpu as pltpu

_HALF_LOG_2PI = 0.5 * math.log(2.0 * math.pi)


# ----------------------------- Pallas kernel ------------------------------ #
def _ppca_partials_kernel(inv_std,
                          wT_ref, zselT_ref, z_ref, counts_ref, mask_ref,
                          wlocT_ref, winvT_ref, zloc_ref, zinv_ref,
                          ll_out, wsq_out, rwsq_out, zsq_out, rzsq_out,
                          acc_zp, acc_ze):
    nt = pl.program_id(1)
    last_nt = pl.num_programs(1) - 1

    # --- z prior / entropy partials: element-wise VPU accumulation ---------
    z = z_ref[...]                                   # [SB, L, TN]
    zr = (z - zloc_ref[...]) * zinv_ref[...]         # precomputed 1/scale

    @pl.when(nt == 0)
    def _():
        acc_zp[...] = z * z
        acc_ze[...] = zr * zr

    @pl.when(nt != 0)
    def _():
        acc_zp[...] += z * z
        acc_ze[...] += zr * zr

    # --- likelihood + w terms: once per sample block (nt == 0) -------------
    @pl.when(nt == 0)
    def _():
        w = wT_ref[...]                              # [SB, L, D]
        zs = zselT_ref[...]                          # [SB, B, L]
        # loc^T = z_sel^T @ w^T -> [SB, B, D]; counts/mask stay native [B, D].
        loc = jnp.einsum('sbl,sld->sbd', zs, w,
                         preferred_element_type=jnp.float32)
        resid = (counts_ref[...] - loc) * inv_std
        ll_out[...] = jnp.sum(mask_ref[...] * (resid * resid), keepdims=True)
        wsq_out[...] = jnp.sum(w * w, keepdims=True)
        rw = (w - wlocT_ref[...]) * winvT_ref[...]
        rwsq_out[...] = jnp.sum(rw * rw, keepdims=True)

    # --- finalize z partials once per sample block --------------------------
    @pl.when(nt == last_nt)
    def _():
        zsq_out[...] = jnp.sum(acc_zp[...], keepdims=True)
        rzsq_out[...] = jnp.sum(acc_ze[...], keepdims=True)


# ------------------------------- wrapper ----------------------------------- #
def ppca_elbo_pallas(w_samples, z_samples, datapoints_indices, counts,
                     holdout_mask, w_loc, w_scale, z_loc, z_scale,
                     stddv_datapoints, num_datapoints,
                     sample_block=8, n_tile=512):
    S, D, L = w_samples.shape
    N = z_samples.shape[2]
    B = counts.shape[0]
    std = float(stddv_datapoints)

    # Sample blocking: amortize per-grid-step overhead over SB MC samples.
    SB = min(sample_block, S)
    while S % SB:
        SB -= 1
    Sg = S // SB

    # N tiling: lane-dense tiles, multiples of 128 when N allows it.
    if N % 128 == 0:
        TN = 128
        while TN * 2 <= min(N, n_tile) and N % (TN * 2) == 0:
            TN *= 2
    else:
        TN = N
    NT = N // TN

    # --- S-invariant precompute (hoisted out of the grid loop) --------------
    wT = jnp.swapaxes(w_samples, 1, 2)                          # [S, L, D]
    z_selT = jnp.swapaxes(
        jnp.take(z_samples, datapoints_indices, axis=2), 1, 2)  # [S, B, L]
    mask_keep = (1.0 - holdout_mask).astype(jnp.float32)        # [B, D]
    counts_f = counts.astype(jnp.float32)                       # [B, D]
    w_locT = jnp.transpose(w_loc)                               # [L, D]
    w_invT = jnp.transpose(1.0 / w_scale)                       # [L, D]
    z_inv = 1.0 / z_scale                                       # [L, N]

    kernel = functools.partial(_ppca_partials_kernel, 1.0 / std)

    scalar_spec = pl.BlockSpec((1, 1, 1), lambda s, t: (s, 0, 0))
    out_shapes = tuple(jax.ShapeDtypeStruct((Sg, 1, 1), jnp.float32)
                       for _ in range(5))

    partials = pl.pallas_call(
        kernel,
        out_shape=out_shapes,
        grid=(Sg, NT),
        in_specs=[
            pl.BlockSpec((SB, L, D), lambda s, t: (s, 0, 0)),    # w^T samples
            pl.BlockSpec((SB, B, L), lambda s, t: (s, 0, 0)),    # z_sel^T
            pl.BlockSpec((SB, L, TN), lambda s, t: (s, 0, t)),   # z tiles
            pl.BlockSpec((B, D), lambda s, t: (0, 0)),           # counts
            pl.BlockSpec((B, D), lambda s, t: (0, 0)),           # keep-mask
            pl.BlockSpec((L, D), lambda s, t: (0, 0)),           # w_loc^T
            pl.BlockSpec((L, D), lambda s, t: (0, 0)),           # 1/w_scale^T
            pl.BlockSpec((L, TN), lambda s, t: (0, t)),          # z_loc tile
            pl.BlockSpec((L, TN), lambda s, t: (0, t)),          # 1/z_scale tile
        ],
        out_specs=tuple(scalar_spec for _ in range(5)),
        scratch_shapes=[pltpu.VMEM((SB, L, TN), jnp.float32),
                        pltpu.VMEM((SB, L, TN), jnp.float32)],
        compiler_params=pltpu.CompilerParams(
            dimension_semantics=("parallel", "arbitrary")),
    )(wT, z_selT, z_samples, counts_f, mask_keep,
      w_locT, w_invT, z_loc, z_inv)

    ll_sq, w_sq, rw_sq, z_sq, rz_sq = (jnp.sum(p) for p in partials)

    # --- constant / scalar glue (same normalizations as the torch module) ---
    K = math.log(std) + _HALF_LOG_2PI
    n_w = D * L
    n_z = L * N
    mask_count = jnp.sum(mask_keep)
    sum_log_scales = jnp.sum(jnp.log(w_scale)) + jnp.sum(jnp.log(z_scale))

    data_log_likelihood = (num_datapoints / (B * D)) * (
        -0.5 * ll_sq / S - K * mask_count)
    log_prior = -0.5 * (w_sq + z_sq) / S - _HALF_LOG_2PI * (n_w + n_z)
    entropy = (0.5 * (rw_sq + rz_sq) / S + sum_log_scales
               + _HALF_LOG_2PI * (n_w + n_z))
    elbo = data_log_likelihood + log_prior + entropy
    return elbo, data_log_likelihood, log_prior, entropy


# --------------------------- pure-JAX reference ---------------------------- #
def ppca_elbo_ref(w_samples, z_samples, datapoints_indices, counts,
                  holdout_mask, w_loc, w_scale, z_loc, z_scale,
                  std, num_datapoints):
    S, D, L = w_samples.shape
    B = counts.shape[0]
    z_sel = z_samples[:, :, datapoints_indices]                        # [S, L, B]
    loc = jnp.swapaxes(jnp.matmul(w_samples, z_sel), 1, 2)             # [S, B, D]
    ll = -0.5 * ((counts - loc) / std) ** 2 - math.log(std) - _HALF_LOG_2PI
    dll = jnp.sum(ll * (1.0 - holdout_mask), axis=1) * (num_datapoints / B)
    data_ll = jnp.mean(dll)

    lp_w = jnp.sum(-0.5 * w_samples ** 2 - _HALF_LOG_2PI, axis=(1, 2))
    lp_z = jnp.sum(-0.5 * z_samples ** 2 - _HALF_LOG_2PI, axis=(1, 2))
    log_prior = jnp.mean(lp_w + lp_z)

    lqw = -0.5 * ((w_samples - w_loc) / w_scale) ** 2 - jnp.log(w_scale) - _HALF_LOG_2PI
    lqz = -0.5 * ((z_samples - z_loc) / z_scale) ** 2 - jnp.log(z_scale) - _HALF_LOG_2PI
    entropy = jnp.mean(-(jnp.sum(lqw, axis=(1, 2)) + jnp.sum(lqz, axis=(1, 2))))
    return data_ll + log_prior + entropy


# ------------------------------ param setup -------------------------------- #
def xavier_uniform(key, shape):
    fan_out, fan_in = shape
    a = math.sqrt(6.0 / (fan_in + fan_out))
    return jax.random.uniform(key, shape, jnp.float32, minval=-a, maxval=a)


if __name__ == "__main__":
    # small, forward-consistent sizes
    num_datapoints = 16   # N
    data_dim = 8          # D
    latent_dim = 4        # L
    num_samples = 2       # S (Monte-Carlo samples)
    batch_size = 8        # B
    stddv_datapoints = 0.5

    key = jax.random.PRNGKey(0)
    ks = jax.random.split(key, 10)

    # variational parameters (deterministic synthetic init, xavier_uniform as in torch)
    w_loc = xavier_uniform(ks[0], (data_dim, latent_dim))
    w_log_scale = xavier_uniform(ks[1], (data_dim, latent_dim))
    z_loc = xavier_uniform(ks[2], (latent_dim, num_datapoints))
    z_log_scale = xavier_uniform(ks[3], (latent_dim, num_datapoints))
    w_scale = jax.nn.softplus(w_log_scale)
    z_scale = jax.nn.softplus(z_log_scale)

    # reparameterized samples (glue; the rsample noise is drawn host-side)
    eps_w = jax.random.normal(ks[4], (num_samples, data_dim, latent_dim), jnp.float32)
    eps_z = jax.random.normal(ks[5], (num_samples, latent_dim, num_datapoints), jnp.float32)
    w_samples = w_loc + w_scale * eps_w
    z_samples = z_loc + z_scale * eps_z

    # forward-pass inputs
    datapoints_indices = jax.random.randint(ks[6], (batch_size,), 0, num_datapoints)
    data = jax.random.normal(ks[7], (batch_size, data_dim), jnp.float32)
    holdout_mask = jax.random.bernoulli(ks[8], 0.2, (batch_size, data_dim)).astype(jnp.float32)

    elbo, dll, lp, ent = ppca_elbo_pallas(
        w_samples, z_samples, datapoints_indices, data, holdout_mask,
        w_loc, w_scale, z_loc, z_scale, stddv_datapoints, num_datapoints)
    elbo = jax.block_until_ready(elbo)

    elbo_ref = ppca_elbo_ref(
        w_samples, z_samples, datapoints_indices, data, holdout_mask,
        w_loc, w_scale, z_loc, z_scale, stddv_datapoints, num_datapoints)

    np.testing.assert_allclose(np.asarray(elbo), np.asarray(elbo_ref),
                               rtol=2e-4, atol=1e-3)

    # TODO(synk): tensorboard SummaryWriter logging (step % print_steps) has no
    # Pallas equivalent and is omitted; predictive_check is host-side numpy/scipy.
    print("KERNEL_OK")
</pallas_src>

<mosaic_0001>
module attributes {stable_mosaic.version = 11 : i64} {
  func.func @_ppca_partials_kernel(%arg0: i32, %arg1: i32, %arg2: memref<2x4x8xf32, #tpu.memory_space<vmem>>, %arg3: memref<2x8x4xf32, #tpu.memory_space<vmem>>, %arg4: memref<2x4x16xf32, #tpu.memory_space<vmem>>, %arg5: memref<8x8xf32, #tpu.memory_space<vmem>>, %arg6: memref<8x8xf32, #tpu.memory_space<vmem>>, %arg7: memref<4x8xf32, #tpu.memory_space<vmem>>, %arg8: memref<4x8xf32, #tpu.memory_space<vmem>>, %arg9: memref<4x16xf32, #tpu.memory_space<vmem>>, %arg10: memref<4x16xf32, #tpu.memory_space<vmem>>, %arg11: memref<1x1x1xf32, #tpu.memory_space<vmem>>, %arg12: memref<1x1x1xf32, #tpu.memory_space<vmem>>, %arg13: memref<1x1x1xf32, #tpu.memory_space<vmem>>, %arg14: memref<1x1x1xf32, #tpu.memory_space<vmem>>, %arg15: memref<1x1x1xf32, #tpu.memory_space<vmem>>, %arg16: memref<2x4x16xf32, #tpu.memory_space<vmem>>, %arg17: memref<2x4x16xf32, #tpu.memory_space<vmem>>) attributes {dimension_semantics = [#tpu.dimension_semantics<parallel>, #tpu.dimension_semantics<arbitrary>], iteration_bounds = array<i64: 1, 1>, scalar_prefetch = 0 : i64, scratch_operands = 2 : i64, tpu.core_type = #tpu.core_type<tc>, window_params = [{transform_indices = @transform_0, window_bounds = array<i64: 2, 4, 8>}, {transform_indices = @transform_1, window_bounds = array<i64: 2, 8, 4>}, {transform_indices = @transform_2, window_bounds = array<i64: 2, 4, 16>}, {pipeline_mode = #tpu.pipeline_mode<synchronous>, transform_indices = @transform_3, window_bounds = array<i64: 8, 8>}, {pipeline_mode = #tpu.pipeline_mode<synchronous>, transform_indices = @transform_4, window_bounds = array<i64: 8, 8>}, {pipeline_mode = #tpu.pipeline_mode<synchronous>, transform_indices = @transform_5, window_bounds = array<i64: 4, 8>}, {pipeline_mode = #tpu.pipeline_mode<synchronous>, transform_indices = @transform_6, window_bounds = array<i64: 4, 8>}, {transform_indices = @transform_7, window_bounds = array<i64: 4, 16>}, {transform_indices = @transform_8, window_bounds = array<i64: 4, 16>}, {transform_indices = @transform_9, window_bounds = array<i64: 1, 1, 1>}, {transform_indices = @transform_10, window_bounds = array<i64: 1, 1, 1>}, {transform_indices = @transform_11, window_bounds = array<i64: 1, 1, 1>}, {transform_indices = @transform_12, window_bounds = array<i64: 1, 1, 1>}, {transform_indices = @transform_13, window_bounds = array<i64: 1, 1, 1>}]} {
    %c0 = arith.constant 0 : index
    %c0_0 = arith.constant 0 : index
    %c0_1 = arith.constant 0 : index
    %0 = vector.load %arg4[%c0, %c0_0, %c0_1] : memref<2x4x16xf32, #tpu.memory_space<vmem>>, vector<2x4x16xf32>
    %c0_2 = arith.constant 0 : index
    %c0_3 = arith.constant 0 : index
    %1 = vector.load %arg9[%c0_2, %c0_3] : memref<4x16xf32, #tpu.memory_space<vmem>>, vector<4x16xf32>
    %2 = vector.shape_cast %1 : vector<4x16xf32> to vector<1x4x16xf32>
    %3 = vector.broadcast %2 : vector<1x4x16xf32> to vector<2x4x16xf32>
    %4 = arith.subf %0, %3 : vector<2x4x16xf32>
    %c0_4 = arith.constant 0 : index
    %c0_5 = arith.constant 0 : index
    %5 = vector.load %arg10[%c0_4, %c0_5] : memref<4x16xf32, #tpu.memory_space<vmem>>, vector<4x16xf32>
    %6 = vector.shape_cast %5 : vector<4x16xf32> to vector<1x4x16xf32>
    %7 = vector.broadcast %6 : vector<1x4x16xf32> to vector<2x4x16xf32>
    %8 = arith.mulf %4, %7 : vector<2x4x16xf32>
    %c0_i32 = arith.constant 0 : i32
    %9 = arith.cmpi eq, %arg1, %c0_i32 : i32
    %10 = arith.extui %9 : i1 to i32
    %c0_i32_6 = arith.constant 0 : i32
    %11 = arith.cmpi ne, %10, %c0_i32_6 : i32
    scf.if %11 {
      %21 = arith.mulf %0, %0 : vector<2x4x16xf32>
      %c0_13 = arith.constant 0 : index
      %c0_14 = arith.constant 0 : index
      %c0_15 = arith.constant 0 : index
      %22 = vector.load %arg16[%c0_13, %c0_14, %c0_15] : memref<2x4x16xf32, #tpu.memory_space<vmem>>, vector<2x4x16xf32>
      tpu.vector_store %arg16[%c0_13, %c0_14, %c0_15], %21 {strides = array<i32>} : memref<2x4x16xf32, #tpu.memory_space<vmem>>, vector<2x4x16xf32>,
      %23 = arith.mulf %8, %8 : vector<2x4x16xf32>
      %c0_16 = arith.constant 0 : index
      %c0_17 = arith.constant 0 : index
      %c0_18 = arith.constant 0 : index
      %24 = vector.load %arg17[%c0_16, %c0_17, %c0_18] : memref<2x4x16xf32, #tpu.memory_space<vmem>>, vector<2x4x16xf32>
      tpu.vector_store %arg17[%c0_16, %c0_17, %c0_18], %23 {strides = array<i32>} : memref<2x4x16xf32, #tpu.memory_space<vmem>>, vector<2x4x16xf32>,
    } else {
    }
    %c0_i32_7 = arith.constant 0 : i32
    %12 = arith.cmpi ne, %arg1, %c0_i32_7 : i32
    %13 = arith.extui %12 : i1 to i32
    %c0_i32_8 = arith.constant 0 : i32
    %14 = arith.cmpi ne, %13, %c0_i32_8 : i32
    scf.if %14 {
      %c0_13 = arith.constant 0 : index
      %c0_14 = arith.constant 0 : index
      %c0_15 = arith.constant 0 : index
      %21 = vector.load %arg16[%c0_13, %c0_14, %c0_15] : memref<2x4x16xf32, #tpu.memory_space<vmem>>, vector<2x4x16xf32>
      %22 = arith.mulf %0, %0 : vector<2x4x16xf32>
      %23 = arith.addf %21, %22 : vector<2x4x16xf32>
      %c0_16 = arith.constant 0 : index
      %c0_17 = arith.constant 0 : index
      %c0_18 = arith.constant 0 : index
      %24 = vector.load %arg16[%c0_16, %c0_17, %c0_18] : memref<2x4x16xf32, #tpu.memory_space<vmem>>, vector<2x4x16xf32>
      tpu.vector_store %arg16[%c0_16, %c0_17, %c0_18], %23 {strides = array<i32>} : memref<2x4x16xf32, #tpu.memory_space<vmem>>, vector<2x4x16xf32>,
      %c0_19 = arith.constant 0 : index
      %c0_20 = arith.constant 0 : index
      %c0_21 = arith.constant 0 : index
      %25 = vector.load %arg17[%c0_19, %c0_20, %c0_21] : memref<2x4x16xf32, #tpu.memory_space<vmem>>, vector<2x4x16xf32>
      %26 = arith.mulf %8, %8 : vector<2x4x16xf32>
      %27 = arith.addf %25, %26 : vector<2x4x16xf32>
      %c0_22 = arith.constant 0 : index
      %c0_23 = arith.constant 0 : index
      %c0_24 = arith.constant 0 : index
      %28 = vector.load %arg17[%c0_22, %c0_23, %c0_24] : memref<2x4x16xf32, #tpu.memory_space<vmem>>, vector<2x4x16xf32>
      tpu.vector_store %arg17[%c0_22, %c0_23, %c0_24], %27 {strides = array<i32>} : memref<2x4x16xf32, #tpu.memory_space<vmem>>, vector<2x4x16xf32>,
    } else {
    }
    %c0_i32_9 = arith.constant 0 : i32
    %15 = arith.cmpi eq, %arg1, %c0_i32_9 : i32
    %16 = arith.extui %15 : i1 to i32
    %c0_i32_10 = arith.constant 0 : i32
    %17 = arith.cmpi ne, %16, %c0_i32_10 : i32
    scf.if %17 {
      %c0_13 = arith.constant 0 : index
      %c0_14 = arith.constant 0 : index
      %c0_15 = arith.constant 0 : index
      %21 = vector.load %arg2[%c0_13, %c0_14, %c0_15] : memref<2x4x8xf32, #tpu.memory_space<vmem>>, vector<2x4x8xf32>
      %c0_16 = arith.constant 0 : index
      %c0_17 = arith.constant 0 : index
      %c0_18 = arith.constant 0 : index
      %22 = vector.load %arg3[%c0_16, %c0_17, %c0_18] : memref<2x8x4xf32, #tpu.memory_space<vmem>>, vector<2x8x4xf32>
      "tpu.trace_start"() <{level = 10 : i32, message = "sbl,sld->sbd"}> : () -> ()
      %cst = arith.constant dense<0.000000e+00> : vector<2x8x8xf32>
      %23 = tpu.matmul %22, %21, %cst {dimension_numbers = #tpu.dot_dimension_numbers<[2], [1], [1], [2], [0, 0, 0, 1, 1, 2], [0], [0]>} : vector<2x8x4xf32>, vector<2x4x8xf32>, vector<2x8x8xf32> -> vector<2x8x8xf32>
      "tpu.trace_stop"() : () -> ()
      %c0_19 = arith.constant 0 : index
      %c0_20 = arith.constant 0 : index
      %24 = vector.load %arg5[%c0_19, %c0_20] : memref<8x8xf32, #tpu.memory_space<vmem>>, vector<8x8xf32>
      %25 = vector.shape_cast %24 : vector<8x8xf32> to vector<1x8x8xf32>
      %26 = vector.broadcast %25 : vector<1x8x8xf32> to vector<2x8x8xf32>
      %27 = arith.subf %26, %23 : vector<2x8x8xf32>
      %cst_21 = arith.constant 2.000000e+00 : f32
      %28 = vector.broadcast %cst_21 : f32 to vector<2x8x8xf32>
      %29 = arith.mulf %27, %28 : vector<2x8x8xf32>
      %c0_22 = arith.constant 0 : index
      %c0_23 = arith.constant 0 : index
      %30 = vector.load %arg6[%c0_22, %c0_23] : memref<8x8xf32, #tpu.memory_space<vmem>>, vector<8x8xf32>
      %31 = arith.mulf %29, %29 : vector<2x8x8xf32>
      %32 = vector.shape_cast %30 : vector<8x8xf32> to vector<1x8x8xf32>
      %33 = vector.broadcast %32 : vector<1x8x8xf32> to vector<2x8x8xf32>
      %34 = arith.mulf %33, %31 : vector<2x8x8xf32>
      %35 = vector.shape_cast %34 : vector<2x8x8xf32> to vector<1x2x8x8xf32>
      %cst_24 = arith.constant dense<0.000000e+00> : vector<1xf32>
      %36 = vector.multi_reduction <add>, %35, %cst_24 [1, 2, 3] : vector<1x2x8x8xf32> to vector<1xf32>
      %37 = vector.shape_cast %36 : vector<1xf32> to vector<1x1x1x1xf32>
      %38 = vector.extract %37[0, 0, 0, 0] : f32 from vector<1x1x1x1xf32>
      %39 = vector.broadcast %38 : f32 to vector<1x1x1xf32>
      %c0_25 = arith.constant 0 : index
      %c0_26 = arith.constant 0 : index
      %c0_27 = arith.constant 0 : index
      %40 = vector.load %arg11[%c0_25, %c0_26, %c0_27] : memref<1x1x1xf32, #tpu.memory_space<vmem>>, vector<1x1x1xf32>
      tpu.vector_store %arg11[%c0_25, %c0_26, %c0_27], %39 {strides = array<i32>} : memref<1x1x1xf32, #tpu.memory_space<vmem>>, vector<1x1x1xf32>,
      %41 = arith.mulf %21, %21 : vector<2x4x8xf32>
      %42 = vector.shape_cast %41 : vector<2x4x8xf32> to vector<1x2x4x8xf32>
      %cst_28 = arith.constant dense<0.000000e+00> : vector<1xf32>
      %43 = vector.multi_reduction <add>, %42, %cst_28 [1, 2, 3] : vector<1x2x4x8xf32> to vector<1xf32>
      %44 = vector.shape_cast %43 : vector<1xf32> to vector<1x1x1x1xf32>
      %45 = vector.extract %44[0, 0, 0, 0] : f32 from vector<1x1x1x1xf32>
      %46 = vector.broadcast %45 : f32 to vector<1x1x1xf32>
      %c0_29 = arith.constant 0 : index
      %c0_30 = arith.constant 0 : index
      %c0_31 = arith.constant 0 : index
      %47 = vector.load %arg12[%c0_29, %c0_30, %c0_31] : memref<1x1x1xf32, #tpu.memory_space<vmem>>, vector<1x1x1xf32>
      tpu.vector_store %arg12[%c0_29, %c0_30, %c0_31], %46 {strides = array<i32>} : memref<1x1x1xf32, #tpu.memory_space<vmem>>, vector<1x1x1xf32>,
      %c0_32 = arith.constant 0 : index
      %c0_33 = arith.constant 0 : index
      %48 = vector.load %arg7[%c0_32, %c0_33] : memref<4x8xf32, #tpu.memory_space<vmem>>, vector<4x8xf32>
      %49 = vector.shape_cast %48 : vector<4x8xf32> to vector<1x4x8xf32>
      %50 = vector.broadcast %49 : vector<1x4x8xf32> to vector<2x4x8xf32>
      %51 = arith.subf %21, %50 : vector<2x4x8xf32>
      %c0_34 = arith.constant 0 : index
      %c0_35 = arith.constant 0 : index
      %52 = vector.load %arg8[%c0_34, %c0_35] : memref<4x8xf32, #tpu.memory_space<vmem>>, vector<4x8xf32>
      %53 = vector.shape_cast %52 : vector<4x8xf32> to vector<1x4x8xf32>
      %54 = vector.broadcast %53 : vector<1x4x8xf32> to vector<2x4x8xf32>
      %55 = arith.mulf %51, %54 : vector<2x4x8xf32>
      %56 = arith.mulf %55, %55 : vector<2x4x8xf32>
      %57 = vector.shape_cast %56 : vector<2x4x8xf32> to vector<1x2x4x8xf32>
      %cst_36 = arith.constant dense<0.000000e+00> : vector<1xf32>
      %58 = vector.multi_reduction <add>, %57, %cst_36 [1, 2, 3] : vector<1x2x4x8xf32> to vector<1xf32>
      %59 = vector.shape_cast %58 : vector<1xf32> to vector<1x1x1x1xf32>
      %60 = vector.extract %59[0, 0, 0, 0] : f32 from vector<1x1x1x1xf32>
      %61 = vector.broadcast %60 : f32 to vector<1x1x1xf32>
      %c0_37 = arith.constant 0 : index
      %c0_38 = arith.constant 0 : index
      %c0_39 = arith.constant 0 : index
      %62 = vector.load %arg13[%c0_37, %c0_38, %c0_39] : memref<1x1x1xf32, #tpu.memory_space<vmem>>, vector<1x1x1xf32>
      tpu.vector_store %arg13[%c0_37, %c0_38, %c0_39], %61 {strides = array<i32>} : memref<1x1x1xf32, #tpu.memory_space<vmem>>, vector<1x1x1xf32>,
    } else {
    }
    %c0_i32_11 = arith.constant 0 : i32
    %18 = arith.cmpi eq, %arg1, %c0_i32_11 : i32
    %19 = arith.extui %18 : i1 to i32
    %c0_i32_12 = arith.constant 0 : i32
    %20 = arith.cmpi ne, %19, %c0_i32_12 : i32
    scf.if %20 {
      %c0_13 = arith.constant 0 : index
      %c0_14 = arith.constant 0 : index
      %c0_15 = arith.constant 0 : index
      %21 = vector.load %arg16[%c0_13, %c0_14, %c0_15] : memref<2x4x16xf32, #tpu.memory_space<vmem>>, vector<2x4x16xf32>
      %22 = vector.shape_cast %21 : vector<2x4x16xf32> to vector<1x2x4x16xf32>
      %cst = arith.constant dense<0.000000e+00> : vector<1xf32>
      %23 = vector.multi_reduction <add>, %22, %cst [1, 2, 3] : vector<1x2x4x16xf32> to vector<1xf32>
      %24 = vector.shape_cast %23 : vector<1xf32> to vector<1x1x1x1xf32>
      %25 = vector.extract %24[0, 0, 0, 0] : f32 from vector<1x1x1x1xf32>
      %26 = vector.broadcast %25 : f32 to vector<1x1x1xf32>
      %c0_16 = arith.constant 0 : index
      %c0_17 = arith.constant 0 : index
      %c0_18 = arith.constant 0 : index
      %27 = vector.load %arg14[%c0_16, %c0_17, %c0_18] : memref<1x1x1xf32, #tpu.memory_space<vmem>>, vector<1x1x1xf32>
      tpu.vector_store %arg14[%c0_16, %c0_17, %c0_18], %26 {strides = array<i32>} : memref<1x1x1xf32, #tpu.memory_space<vmem>>, vector<1x1x1xf32>,
      %c0_19 = arith.constant 0 : index
      %c0_20 = arith.constant 0 : index
      %c0_21 = arith.constant 0 : index
      %28 = vector.load %arg17[%c0_19, %c0_20, %c0_21] : memref<2x4x16xf32, #tpu.memory_space<vmem>>, vector<2x4x16xf32>
      %29 = vector.shape_cast %28 : vector<2x4x16xf32> to vector<1x2x4x16xf32>
      %cst_22 = arith.constant dense<0.000000e+00> : vector<1xf32>
      %30 = vector.multi_reduction <add>, %29, %cst_22 [1, 2, 3] : vector<1x2x4x16xf32> to vector<1xf32>
      %31 = vector.shape_cast %30 : vector<1xf32> to vector<1x1x1x1xf32>
      %32 = vector.extract %31[0, 0, 0, 0] : f32 from vector<1x1x1x1xf32>
      %33 = vector.broadcast %32 : f32 to vector<1x1x1xf32>
      %c0_23 = arith.constant 0 : index
      %c0_24 = arith.constant 0 : index
      %c0_25 = arith.constant 0 : index
      %34 = vector.load %arg15[%c0_23, %c0_24, %c0_25] : memref<1x1x1xf32, #tpu.memory_space<vmem>>, vector<1x1x1xf32>
      tpu.vector_store %arg15[%c0_23, %c0_24, %c0_25], %33 {strides = array<i32>} : memref<1x1x1xf32, #tpu.memory_space<vmem>>, vector<1x1x1xf32>,
    } else {
    }
    return
  }
  func.func @transform_0(%arg0: i32, %arg1: i32) -> (i32, i32, i32) {
    %c0_i32 = arith.constant 0 : i32
    %c0_i32_0 = arith.constant 0 : i32
    %c0_i32_1 = arith.constant 0 : i32
    return %arg0, %c0_i32, %c0_i32_0 : i32, i32, i32
  }
  func.func @transform_1(%arg0: i32, %arg1: i32) -> (i32, i32, i32) {
    %c0_i32 = arith.constant 0 : i32
    %c0_i32_0 = arith.constant 0 : i32
    %c0_i32_1 = arith.constant 0 : i32
    return %arg0, %c0_i32, %c0_i32_0 : i32, i32, i32
  }
  func.func @transform_2(%arg0: i32, %arg1: i32) -> (i32, i32, i32) {
    %c0_i32 = arith.constant 0 : i32
    %c0_i32_0 = arith.constant 0 : i32
    return %arg0, %c0_i32, %arg1 : i32, i32, i32
  }
  func.func @transform_3(%arg0: i32, %arg1: i32) -> (i32, i32) {
    %c0_i32 = arith.constant 0 : i32
    %c0_i32_0 = arith.constant 0 : i32
    %c0_i32_1 = arith.constant 0 : i32
    return %c0_i32, %c0_i32_0 : i32, i32
  }
  func.func @transform_4(%arg0: i32, %arg1: i32) -> (i32, i32) {
    %c0_i32 = arith.constant 0 : i32
    %c0_i32_0 = arith.constant 0 : i32
    %c0_i32_1 = arith.constant 0 : i32
    return %c0_i32, %c0_i32_0 : i32, i32
  }
  func.func @transform_5(%arg0: i32, %arg1: i32) -> (i32, i32) {
    %c0_i32 = arith.constant 0 : i32
    %c0_i32_0 = arith.constant 0 : i32
    %c0_i32_1 = arith.constant 0 : i32
    return %c0_i32, %c0_i32_0 : i32, i32
  }
  func.func @transform_6(%arg0: i32, %arg1: i32) -> (i32, i32) {
    %c0_i32 = arith.constant 0 : i32
    %c0_i32_0 = arith.constant 0 : i32
    %c0_i32_1 = arith.constant 0 : i32
    return %c0_i32, %c0_i32_0 : i32, i32
  }
  func.func @transform_7(%arg0: i32, %arg1: i32) -> (i32, i32) {
    %c0_i32 = arith.constant 0 : i32
    %c0_i32_0 = arith.constant 0 : i32
    return %c0_i32, %arg1 : i32, i32
  }
  func.func @transform_8(%arg0: i32, %arg1: i32) -> (i32, i32) {
    %c0_i32 = arith.constant 0 : i32
    %c0_i32_0 = arith.constant 0 : i32
    return %c0_i32, %arg1 : i32, i32
  }
  func.func @transform_9(%arg0: i32, %arg1: i32) -> (i32, i32, i32) {
    %c0_i32 = arith.constant 0 : i32
    %c0_i32_0 = arith.constant 0 : i32
    %c0_i32_1 = arith.constant 0 : i32
    return %arg0, %c0_i32, %c0_i32_0 : i32, i32, i32
  }
  func.func @transform_10(%arg0: i32, %arg1: i32) -> (i32, i32, i32) {
    %c0_i32 = arith.constant 0 : i32
    %c0_i32_0 = arith.constant 0 : i32
    %c0_i32_1 = arith.constant 0 : i32
    return %arg0, %c0_i32, %c0_i32_0 : i32, i32, i32
  }
  func.func @transform_11(%arg0: i32, %arg1: i32) -> (i32, i32, i32) {
    %c0_i32 = arith.constant 0 : i32
    %c0_i32_0 = arith.constant 0 : i32
    %c0_i32_1 = arith.constant 0 : i32
    return %arg0, %c0_i32, %c0_i32_0 : i32, i32, i32
  }
  func.func @transform_12(%arg0: i32, %arg1: i32) -> (i32, i32, i32) {
    %c0_i32 = arith.constant 0 : i32
    %c0_i32_0 = arith.constant 0 : i32
    %c0_i32_1 = arith.constant 0 : i32
    return %arg0, %c0_i32, %c0_i32_0 : i32, i32, i32
  }
  func.func @transform_13(%arg0: i32, %arg1: i32) -> (i32, i32, i32) {
    %c0_i32 = arith.constant 0 : i32
    %c0_i32_0 = arith.constant 0 : i32
    %c0_i32_1 = arith.constant 0 : i32
    return %arg0, %c0_i32, %c0_i32_0 : i32, i32, i32
  }
}

</mosaic_0001>

<bundles_post_ra>
// kernel: tpu_custom_call.1
= control target key start
LH: loop header
LB: loop body
LE: loop exit
PB: predicated region body
PF: predicated region fallthrough
CT: control target
= control target key end

     0   :  { %19 = vsyncpa [#allocation5], 0  ;;  %s783_s0 = inlined_call_operand.vmem [shape: f32[2,4,8], index: 0, kind: input, shape index: {}]   ;;  %s784_s1 = inlined_call_operand.vmem [shape: f32[2,8,4], index: 1, kind: input, shape index: {}]   ;;  %s785_s2 = inlined_call_operand.vmem [shape: f32[2,4,16], index: 2, kind: input, shape index: {}]   ;;  %s786_s3 = inlined_call_operand.vmem [shape: f32[8,8], index: 3, kind: input, shape index: {}]   ;;  %s787_s4 = inlined_call_operand.hbm [shape: f32[8,8], index: 4, kind: input, shape index: {}]   ;;  %s788_s5 = inlined_call_operand.vmem [shape: f32[4,8], index: 5, kind: input, shape index: {}]   ;;  %s789_s6 = inlined_call_operand.hbm [shape: f32[4,8], index: 6, kind: input, shape index: {}]   ;;  %s790_s7 = inlined_call_operand.hbm [shape: f32[4,16], index: 7, kind: input, shape index: {}]   ;;  %s791_s8 = inlined_call_operand.hbm [shape: f32[4,16], index: 8, kind: input, shape index: {}]   ;;  %s792_s9 = inlined_call_operand.hbm [shape: f32[1,1,1], index: 9, kind: output, shape index: {0}]   ;;  %s793_s10 = inlined_call_operand.hbm [shape: f32[1,1,1], index: 10, kind: output, shape index: {1}]   ;;  %s794_s11 = inlined_call_operand.hbm [shape: f32[1,1,1], index: 11, kind: output, shape index: {2}]   ;;  %s795_s12 = inlined_call_operand.hbm [shape: f32[1,1,1], index: 12, kind: output, shape index: {3}]   ;;  %s796_s13 = inlined_call_operand.hbm [shape: f32[1,1,1], index: 13, kind: output, shape index: {4}]  }
   0x1   :  { %20 = vsyncpa [#allocation8], 0 }
   0x2   :  { %21 = vsyncpa [#allocation11], 0 }
   0x3   :  { %22 = vsyncpa [#allocation6], 0 }
   0x4   :  { %23 = vsyncpa [#allocation14], 0  ;;  %s51_s27 = sshll.u32 %s789_s6, 4  ;;  %s52_s27 = int_to_ptr.hbm [resolvable:$true] %s51_s27 }
   0x5   :  { %24 = vsyncpa [#allocation17], 0  ;;  %s628_s28 = smov [#allocation7]   ;;  %s38_s15 = sshll.u32 %s787_s4, 4  ;;  %s39_s15 = int_to_ptr.hbm [resolvable:$true] %s38_s15 }
   0x6   :  { %s53_s29 = sshll.u32 %s628_s28, 4  ;;  %s629_s16 = smov [#allocation4]   ;;  %s54_s29 = int_to_ptr.vmem [resolvable:$true] %s53_s29 }
   0x7   :  { %56 = dma.hbm_to_vmem [thread:$0]  %s52_s27, 64, %s54_s29, [#allocation8]  }
   0x8   :  { %s40_s17 = sshll.u32 %s629_s16, 4  ;;  %s62_s20 = sshll.u32 %s790_s7, 4  ;;  %s41_s17 = int_to_ptr.vmem [resolvable:$true] %s40_s17  ;;  %s63_s20 = int_to_ptr.hbm [resolvable:$true] %s62_s20 }
   0x9   :  { %43 = dma.hbm_to_vmem [thread:$0]  %s39_s15, 128, %s41_s17, [#allocation5]  }
   0xa   :  { %s73_s22 = sshll.u32 %s791_s8, 4  ;;  %s630_s23 = smov [#allocation9]   ;;  %s74_s22 = int_to_ptr.hbm [resolvable:$true] %s73_s22 }
   0xb   :  { %s64_s24 = sshll.u32 %s630_s23, 4  ;;  %s631_s4 = smov [#allocation10]   ;;  %s65_s24 = int_to_ptr.vmem [resolvable:$true] %s64_s24 }
   0xc   :  { %67 = dma.hbm_to_vmem [thread:$0]  %s63_s20, 64, %s65_s24, [#allocation8]  }
   0xd   :  { %s75_s25 = sshll.u32 %s631_s4, 4  ;;  %s76_s25 = int_to_ptr.vmem [resolvable:$true] %s75_s25 }
   0xe   :  { %78 = dma.hbm_to_vmem [thread:$0]  %s74_s22, 64, %s76_s25, [#allocation11]  }
   0xf   :  { %616 = dma.done.wait [#allocation5], 128  }
  0x10   :  { %617 = vsyncadd [#allocation5], 4294967168 }
  0x11   :  { %618 = dma.done.wait [#allocation8], 128  }
  0x12   :  { %619 = vsyncadd [#allocation8], 4294967168 }
  0x13   :  { %620 = dma.done.wait [#allocation11], 64  }
  0x14   :  { %621 = vsyncadd [#allocation11], 4294967232  ;;  %vm148_vm0 = vcmask 1043456   ;;  %vm144_vm1 = vcmask 31744   ;;  %v140_v0 = vld [vmem:[%s783_s0] sm:$0xf] }
  0x15   :  { %v141_v1 = vld [vmem:[%s783_s0 + $0x4] sm:$0xf]  ;;  %377 = vmatpush.msk.msra.mxu0 %vm148_vm0, %v140_v0  ;;  %v143_v3 = vld [vmem:[%s784_s1 + $0x8] sm:$0xff]  ;;  %v241_v4 = vld [vmem:[%s788_s5] sm:$0xf]  ;;  %vm226_vm2 = vcmask 60416   ;;  %v224_v27 = vmul.f32 %v140_v0, %v140_v0 }
  0x16   :  { %379 = vmatpush.msk.msra.mxu1 %vm148_vm0, %v141_v1  ;;  %v142_v2 = vld [vmem:[%s784_s1] sm:$0xff]  ;;  %v242_v5 = vsub.f32 %v140_v0, %v241_v4  ;;  %v243_v6 = vsub.f32 %v141_v1, %v241_v4  ;;  %v97_v9 = vld [vmem:[#allocation9] sm:$0xf]  ;;  %v244_v10 = vld [vmem:[#allocation7] sm:$0xf]  ;;  %vm109_vm3 = vcmask 125952   ;;  %v225_v28 = vmul.f32 %v141_v1, %v141_v1 }
  0x17   :  { %378 = vmatmul.msk.f32.vlgmr.msra.gmra.mxu0 %vm144_vm1, %v142_v2  ;;  %380 = vmatmul.msk.f32.vlgmr.msra.gmra.mxu1 %vm144_vm1, %v143_v3  ;;  %v95_v7 = vld [vmem:[%s785_s2] sm:$0xf]  ;;  %v96_v8 = vld [vmem:[%s785_s2 + $0x4] sm:$0xf]  ;;  %v227_v34 = vsel %vm226_vm2, %v224_v27, 0.0  ;;  %v203_v49 = vld [vmem:[#allocation4] sm:$0xff] }
  0x18   :  { %v98_v11 = vsub.f32 %v95_v7, %v97_v9  ;;  %v99_v12 = vsub.f32 %v96_v8, %v97_v9  ;;  %v245_v13 = vmul.f32 %v244_v10, %v242_v5  ;;  %v246_v14 = vmul.f32 %v244_v10, %v243_v6  ;;  %v100_v15 = vld [vmem:[#allocation10] sm:$0xf]  ;;  %s303_s20 = sshll.u32 %s792_s9, 4  ;;  %s632_s6 = smov [#allocation12]   ;;  %s304_s20 = int_to_ptr.hbm [resolvable:$true] %s303_s20 }
  0x19   :  { %v107_v20 = vmul.f32 %v95_v7, %v95_v7  ;;  %v108_v21 = vmul.f32 %v96_v8, %v96_v8  ;;  %v228_v35 = vsel %vm226_vm2, %v225_v28, 0.0  ;;  %v198_v42 = vld [vmem:[%s786_s3] sm:$0xff]  ;;  %vm208_vm4 = vcmask 64512   ;;  %s301_s21 = sshll.u32 %s632_s6, 4  ;;  %s633_s22 = smov [#allocation13]   ;;  %s302_s21 = int_to_ptr.vmem [resolvable:$true] %s301_s21 }
  0x1a   :  { %v101_v16 = vmul.f32 %v100_v15, %v98_v11  ;;  %v102_v17 = vmul.f32 %v100_v15, %v99_v12  ;;  %v247_v18 = vmul.f32 %v245_v13, %v245_v13  ;;  %v248_v19 = vmul.f32 %v246_v14, %v246_v14  ;;  %s758_s23 = sshll.u32 %s633_s22, 4  ;;  %s314_s25 = sshll.u32 %s793_s10, 4  ;;  %s313_s23 = int_to_ptr.vmem [resolvable:$true] %s758_s23  ;;  %s315_s25 = int_to_ptr.hbm [resolvable:$true] %s314_s25 }
  0x1b   :  { %110 = vst.msk [vmem:[#allocation2] sm:$0xf] %vm109_vm3, %v107_v20  ;;  %v229_v39 = vadd.f32 %v228_v35, %v227_v34  ;;  %vm222_vm5 = vcmask 0   ;;  %s634_s26 = smov [#allocation16]   ;;  %s336_s28 = sshll.u32 %s795_s12, 4  ;;  %s337_s28 = int_to_ptr.hbm [resolvable:$true] %s336_s28 }
  0x1c   :  { %v112_v22 = vmul.f32 %v101_v16, %v101_v16  ;;  %v113_v23 = vmul.f32 %v102_v17, %v102_v17  ;;  %v249_v24 = vsel %vm226_vm2, %v247_v18, 0.0  ;;  %v250_v25 = vsel %vm226_vm2, %v248_v19, 0.0  ;;  %111 = vst.msk [vmem:[#allocation2 + $0x4] sm:$0xf] %vm109_vm3, %v108_v21  ;;  %s765_s9 = sshll.u32 %s634_s26, 4  ;;  %s635_s29 = smov [#allocation15]   ;;  %s335_s9 = int_to_ptr.vmem [resolvable:$true] %s765_s9 }
  0x1d   :  { %v251_v26 = vadd.f32 %v250_v25, %v249_v24  ;;  %s323_s30 = sshll.u32 %s635_s29, 4  ;;  %s325_s15 = sshll.u32 %s794_s11, 4  ;;  %s324_s30 = int_to_ptr.vmem [resolvable:$true] %s323_s30  ;;  %s326_s15 = int_to_ptr.hbm [resolvable:$true] %s325_s15 }
  0x1e   :  { %114 = vst.msk [vmem:[#allocation3] sm:$0xf] %vm109_vm3, %v112_v22  ;;  %s347_s0 = sshll.u32 %s796_s13, 4  ;;  %s636_s19 = smov [#allocation18]   ;;  %s348_s0 = int_to_ptr.hbm [resolvable:$true] %s347_s0 }
  0x1f   :  { %252 = vadd.xlane.f32.xlu1 %v251_v26  ;;  %115 = vst.msk [vmem:[#allocation3 + $0x4] sm:$0xf] %vm109_vm3, %v113_v23  ;;  %s345_s1 = sshll.u32 %s636_s19, 4  ;;  %s346_s1 = int_to_ptr.vmem [resolvable:$true] %s345_s1 }
  0x22   :  { %v263_v29 = vld [vmem:[#allocation2] sm:$0xf] }
  0x23   :  { %v264_v30 = vld [vmem:[#allocation2 + $0x4] sm:$0xf]  ;;  %v266_v31 = vsel %vm109_vm3, %v263_v29, 0.0 }
  0x24   :  { %v267_v32 = vsel %vm109_vm3, %v264_v30, 0.0 }
  0x25   :  { %v280_v33 = vld [vmem:[#allocation3] sm:$0xf]  ;;  %v268_v36 = vadd.f32 %v267_v32, %v266_v31 }
  0x26   :  { %v281_v37 = vld [vmem:[#allocation3 + $0x4] sm:$0xf]  ;;  %v282_v38 = vsel %vm109_vm3, %v280_v33, 0.0 }
  0x27   :  { %v283_v40 = vsel %vm109_vm3, %v281_v37, 0.0  ;;  %269 = vadd.xlane.f32.xlu1 %v268_v36 }
  0x28   :  { %v284_v41 = vadd.f32 %v283_v40, %v282_v38 }
  0x2a   :  { %285 = vadd.xlane.f32.xlu2 %v284_v41 }
  0x92   :  { %v253_v57 = vpop.xlane.xlu1 %252 }
  0x93   :  { %v254_v60 = vrot.slane %v253_v57, 4 }
  0x94   :  { %v169_v43 = vpop.f32.mrf.mxu0  ;;  %v195_v44 = vpop.f32.mrf.mxu1 }
  0x95   :  { %v199_v45 = vsub.f32 %v198_v42, %v169_v43  ;;  %v200_v46 = vsub.f32 %v198_v42, %v195_v44  ;;  %v255_v2 = vadd.f32 %v254_v60, %v253_v57 }
  0x97   :  { %v201_v47 = vmul.f32 2.0, %v199_v45  ;;  %v202_v48 = vmul.f32 2.0, %v200_v46  ;;  %v256_v7 = vrot.slane %v255_v2, 2 }
  0x99   :  { %v204_v50 = vmul.f32 %v201_v47, %v201_v47  ;;  %v205_v51 = vmul.f32 %v202_v48, %v202_v48  ;;  %v257_v15 = vadd.f32 %v256_v7, %v255_v2 }
  0x9a   :  { %v270_v58 = vpop.xlane.xlu1 %269 }
  0x9b   :  { %v206_v52 = vmul.f32 %v204_v50, %v203_v49  ;;  %v207_v53 = vmul.f32 %v205_v51, %v203_v49  ;;  %v271_v63 = vrot.slane %v270_v58, 4  ;;  %v258_v20 = vrot.slane %v257_v15, 1 }
  0x9d   :  { %v209_v54 = vsel %vm208_vm4, %v206_v52, 0.0  ;;  %v210_v55 = vsel %vm208_vm4, %v207_v53, 0.0  ;;  %v286_v59 = vpop.xlane.xlu2 %285  ;;  %v272_v4 = vadd.f32 %v271_v63, %v270_v58  ;;  %v259_v25 = vadd.f32 %v258_v20, %v257_v15 }
  0x9e   :  { %v211_v56 = vadd.f32 %v210_v55, %v209_v54  ;;  %v287_v0 = vrot.slane %v286_v59, 4 }
  0x9f   :  { %v273_v9 = vrot.slane %v272_v4, 2 }
  0xa0   :  { %212 = vadd.xlane.f32.xlu0 %v211_v56  ;;  %v288_v5 = vadd.f32 %v287_v0, %v286_v59 }
  0xa1   :  { %v274_v16 = vadd.f32 %v273_v9, %v272_v4 }
  0xa2   :  { %v289_v12 = vrot.slane %v288_v5, 2 }
  0xa3   :  { %v275_v22 = vrot.slane %v274_v16, 1 }
  0xa4   :  { %v290_v18 = vadd.f32 %v289_v12, %v288_v5 }
  0xa5   :  { %v276_v26 = vadd.f32 %v275_v22, %v274_v16 }
  0xa6   :  { %v291_v23 = vrot.slane %v290_v18, 1 }
  0xa8   :  { %230 = vadd.xlane.f32.xlu0 %v229_v39  ;;  %v292_v27 = vadd.f32 %v291_v23, %v290_v18 }
 0x113   :  { %v213_v61 = vpop.xlane.xlu0 %212 }
 0x114   :  { %v214_v62 = vrot.slane %v213_v61, 4 }
 0x116   :  { %v215_v1 = vadd.f32 %v214_v62, %v213_v61 }
 0x118   :  { %v216_v3 = vrot.slane %v215_v1, 2 }
 0x11a   :  { %v217_v6 = vadd.f32 %v216_v3, %v215_v1 }
 0x11b   :  { %v231_v8 = vpop.xlane.xlu0 %230 }
 0x11c   :  { %v232_v10 = vrot.slane %v231_v8, 4  ;;  %v218_v11 = vrot.slane %v217_v6, 1 }
 0x11e   :  { %v233_v13 = vadd.f32 %v232_v10, %v231_v8  ;;  %v219_v14 = vadd.f32 %v218_v11, %v217_v6 }
 0x120   :  { %v234_v17 = vrot.slane %v233_v13, 2  ;;  %381 = vpush %v219_v14 }
 0x122   :  { %v235_v19 = vadd.f32 %v234_v17, %v233_v13 }
 0x124   :  { %v236_v21 = vrot.slane %v235_v19, 1 }
 0x126   :  { %v237_v24 = vadd.f32 %v236_v21, %v235_v19 }
 0x128   :  { %383 = vpush %v237_v24 }
 0x129   :  { %385 = vpush %v259_v25 }
 0x12a   :  { %387 = vpush %v276_v26 }
 0x12b   :  { %389 = vpush %v292_v27 }
 0x151   :  { %s382_s7 = spop %381 }
 0x152   :  { %v221_v28 = vstv %s382_s7 }
 0x153   :  { %223 = vst.msk [vmem:[#allocation12] sm:$0x1] %vm222_vm5, %v221_v28 }
 0x154   :  { %306 = dma.vmem_to_hbm [thread:$0]  %s302_s21, 16, %s304_s20, [#allocation6]  }
 0x159   :  { %s384_s18 = spop %383 }
 0x15a   :  { %v239_v29 = vstv %s384_s18  ;;  %s386_s12 = spop %385 }
 0x15b   :  { %240 = vst.msk [vmem:[#allocation13] sm:$0x1] %vm222_vm5, %v239_v29  ;;  %v261_v30 = vstv %s386_s12  ;;  %s388_s2 = spop %387 }
 0x15c   :  { %262 = vst.msk [vmem:[#allocation15] sm:$0x1] %vm222_vm5, %v261_v30  ;;  %v278_v31 = vstv %s388_s2  ;;  %s390_s11 = spop %389 }
 0x15d   :  { %279 = vst.msk [vmem:[#allocation16] sm:$0x1] %vm222_vm5, %v278_v31  ;;  %v294_v32 = vstv %s390_s11  ;;  %317 = dma.vmem_to_hbm [thread:$0]  %s313_s23, 16, %s315_s25, [#allocation14]  }
 0x15e   :  { %295 = vst.msk [vmem:[#allocation18] sm:$0x1] %vm222_vm5, %v294_v32  ;;  %339 = dma.vmem_to_hbm [thread:$0]  %s335_s9, 16, %s337_s28, [#allocation17]  }
 0x15f   :  { %328 = dma.vmem_to_hbm [thread:$0]  %s324_s30, 16, %s326_s15, [#allocation14]  }
 0x160   :  { %350 = dma.vmem_to_hbm [thread:$0]  %s346_s1, 16, %s348_s0, [#allocation17]  }
 0x161   :  { %622 = dma.done.wait [#allocation6], 16  }
 0x162   :  { %623 = vsyncadd [#allocation6], 4294967280 }
 0x163   :  { %624 = dma.done.wait [#allocation14], 32  }
 0x164   :  { %625 = vsyncadd [#allocation14], 4294967264 }
 0x165   :  { %626 = dma.done.wait [#allocation17], 32  }
 0x166   :  { %627 = vsyncadd [#allocation17], 4294967264 }
 0x167   :  { %371 = vsyncpa [#allocation5], 1 }
 0x168   :  { %372 = vsyncpa [#allocation8], 1 }
 0x169   :  { %373 = vsyncpa [#allocation11], 1 }
 0x16a   :  { %374 = vsyncpa [#allocation6], 1 }
 0x16b   :  { %375 = vsyncpa [#allocation14], 1 }
 0x16c   :  { %376 = vsyncpa [#allocation17], 1 }

</bundles_post_ra>
